<compile_context>
chip_gen: v7x
topology: tpu7x:2x2x1
jax: 0.10.0
libtpu: 0.0.40
codegen_flags: <defaults>
</compile_context>

<pallas_src>
import functools

import jax
import jax.numpy as jnp
from jax import lax
from jax.experimental import pallas as pl
from jax.experimental.pallas import tpu as pltpu


def _diff_loss_kernel(m1_ref, m2_ref, x1_ref, x2_ref, o_ref, acc_ref, *,
                      use_bf16):
    step = pl.program_id(0)

    @pl.when(step == 0)
    def _():
        acc_ref[...] = jnp.zeros_like(acc_ref)

    # --- center this batch tile with the global column means (dim=0) ---
    x1 = x1_ref[...].astype(jnp.float32) - m1_ref[...]        # (bn, D1)
    x2 = x2_ref[...].astype(jnp.float32) - m2_ref[...]        # (bn, D2)
    d1 = x1.shape[1]
    d2 = x2.shape[1]

    # --- per-row inverse L2 norms via EUP rsqrt: 1 / max(||x||, 1e-12) ---
    ss1 = jnp.sum(x1 * x1, axis=1, keepdims=True)             # (bn, 1)
    ss2 = jnp.sum(x2 * x2, axis=1, keepdims=True)             # (bn, 1)
    big = jnp.float32(1e12)                                   # = 1 / eps
    inv1 = jnp.minimum(lax.rsqrt(ss1), big)
    inv2 = jnp.minimum(lax.rsqrt(ss2), big)

    if use_bf16:
        # Scale each operand by its own inverse norm (keeps magnitudes <= 1,
        # safe for bf16), then cast for the MXU. Accumulation stays f32.
        a = (x1 * inv1).astype(jnp.bfloat16)
        b = (x2 * inv2).astype(jnp.bfloat16)
    else:
        # f32 path: fold both inverse norms into the narrower operand:
        # corr[a,b] = sum_n x1c[n,a] * x2c[n,b] * inv1[n] * inv2[n].
        inv12 = inv1 * inv2
        if d2 <= d1:
            a, b = x1, x2 * inv12
        else:
            a, b = x1 * inv12, x2

    # --- direct correlation accumulation: contract over batch (dim 0) ---
    # Constant-size (D1, D2) accumulator, independent of total batch N.
    acc_ref[...] += lax.dot_general(
        a, b, dimension_numbers=(((0,), (0,)), ((), ())),
        preferred_element_type=jnp.float32)

    @pl.when(step == pl.num_programs(0) - 1)
    def _():
        corr = acc_ref[...]
        loss = jnp.sum(corr * corr) / jnp.float32(d1 * d2)
        # Clamp at 0 (matches `if diff_loss < 0: diff_loss = 0`).
        o_ref[0, 0] = jnp.maximum(loss, jnp.float32(0.0))


def _pick_block_n(n, max_block=512):
    """Largest multiple-of-8 divisor of n that is <= max_block (else n)."""
    if n <= max_block:
        return n
    for b in range(max_block, 7, -1):
        if n % b == 0 and b % 8 == 0:
            return b
    return n


def diff_loss(input1: jax.Array, input2: jax.Array, *,
              max_block_n: int = 512,
              bf16_min_feature_dim: int = 256) -> jax.Array:
    """Pallas implementation of DiffLoss.forward. Inputs: (N, D1), (N, D2)."""
    assert input1.ndim == 2 and input2.ndim == 2
    assert input1.shape[0] == input2.shape[0]
    n, d1 = input1.shape
    _, d2 = input2.shape

    # Global column means (dim=0). Cheap O(N*D) reduction; streaming them into
    # the kernel keeps the main pipeline single-pass over the batch tiles.
    m1 = jnp.mean(input1.astype(jnp.float32), axis=0, keepdims=True)  # (1, D1)
    m2 = jnp.mean(input2.astype(jnp.float32), axis=0, keepdims=True)  # (1, D2)

    bn = _pick_block_n(n, max_block_n)
    grid = (n // bn,)

    # bf16 MXU operands only at production feature widths (f32 matmul is
    # multi-pass emulated on v5e/v6e/v7x; irrelevant at toy widths).
    use_bf16 = min(d1, d2) >= bf16_min_feature_dim

    in_bytes = input1.dtype.itemsize
    est = (2 * bn * (d1 + d2) * in_bytes      # double-buffered input tiles
           + 2 * (d1 + d2) * 4                # resident mean rows
           + d1 * d2 * 4)                     # corr accumulator scratch
    vmem_limit = int(min(64 * 2**20, max(16 * 2**20, 2 * est + (1 << 20))))

    kernel = functools.partial(_diff_loss_kernel, use_bf16=use_bf16)

    out = pl.pallas_call(
        kernel,
        out_shape=jax.ShapeDtypeStruct((1, 1), jnp.float32),
        grid_spec=pltpu.PrefetchScalarGridSpec(
            num_scalar_prefetch=0,
            grid=grid,
            in_specs=[
                pl.BlockSpec((1, d1), lambda i: (0, 0)),    # m1 (resident)
                pl.BlockSpec((1, d2), lambda i: (0, 0)),    # m2 (resident)
                pl.BlockSpec((bn, d1), lambda i: (i, 0)),   # x1 batch tile
                pl.BlockSpec((bn, d2), lambda i: (i, 0)),   # x2 batch tile
            ],
            out_specs=pl.BlockSpec(memory_space=pltpu.SMEM),
            scratch_shapes=[pltpu.VMEM((d1, d2), jnp.float32)],
        ),
        compiler_params=pltpu.CompilerParams(
            dimension_semantics=("arbitrary",),
            vmem_limit_bytes=vmem_limit,
        ),
    )(m1, m2, input1, input2)
    return out[0, 0]


def _diff_loss_ref(x1, x2):
    """Pure-JAX reference mirroring the PyTorch forward, for sanity checking."""
    x1 = x1 - jnp.mean(x1, axis=0, keepdims=True)
    x2 = x2 - jnp.mean(x2, axis=0, keepdims=True)
    x1 = x1 / jnp.maximum(jnp.linalg.norm(x1, axis=1, keepdims=True), 1e-12)
    x2 = x2 / jnp.maximum(jnp.linalg.norm(x2, axis=1, keepdims=True), 1e-12)
    corr = x1.T @ x2
    return jnp.maximum(jnp.mean(corr ** 2), 0.0)


if __name__ == "__main__":
    key = jax.random.PRNGKey(0)
    k1, k2 = jax.random.split(key)

    # Small shapes consistent with the module: batch=8, hidden dims 32 / 16.
    N, D1, D2 = 8, 32, 16
    input1 = jax.random.normal(k1, (N, D1), dtype=jnp.float32)
    input2 = jax.random.normal(k2, (N, D2), dtype=jnp.float32)

    loss = diff_loss(input1, input2)
    jax.block_until_ready(loss)

    ref = _diff_loss_ref(input1, input2)
    assert jnp.allclose(loss, ref, atol=1e-5, rtol=1e-5), (loss, ref)

    print("KERNEL_OK")
</pallas_src>

<mosaic_0001>
module attributes {stable_mosaic.version = 11 : i64} {
  func.func @_diff_loss_kernel(%arg0: i32, %arg1: memref<1x32xf32, #tpu.memory_space<vmem>>, %arg2: memref<1x16xf32, #tpu.memory_space<vmem>>, %arg3: memref<8x32xf32, #tpu.memory_space<vmem>>, %arg4: memref<8x16xf32, #tpu.memory_space<vmem>>, %arg5: memref<1x1xf32, #tpu.memory_space<smem>>, %arg6: memref<32x16xf32, #tpu.memory_space<vmem>>) attributes {dimension_semantics = [#tpu.dimension_semantics<arbitrary>], iteration_bounds = array<i64: 1>, scalar_prefetch = 0 : i64, scratch_operands = 1 : i64, tpu.core_type = #tpu.core_type<tc>, window_params = [{pipeline_mode = #tpu.pipeline_mode<synchronous>, transform_indices = @transform_0, window_bounds = array<i64: 1, 32>}, {pipeline_mode = #tpu.pipeline_mode<synchronous>, transform_indices = @transform_1, window_bounds = array<i64: 1, 16>}, {transform_indices = @transform_2, window_bounds = array<i64: 8, 32>}, {transform_indices = @transform_3, window_bounds = array<i64: 8, 16>}, {transform_indices = @transform_4, window_bounds = array<i64: 1, 1>}]} {
    %c0_i32 = arith.constant 0 : i32
    %0 = arith.cmpi eq, %arg0, %c0_i32 : i32
    %1 = arith.extui %0 : i1 to i32
    %c0_i32_0 = arith.constant 0 : i32
    %2 = arith.cmpi ne, %1, %c0_i32_0 : i32
    scf.if %2 {
      %cst_18 = arith.constant 0.000000e+00 : f32
      %33 = vector.broadcast %cst_18 : f32 to vector<32x16xf32>
      %c0_19 = arith.constant 0 : index
      %c0_20 = arith.constant 0 : index
      %34 = vector.load %arg6[%c0_19, %c0_20] : memref<32x16xf32, #tpu.memory_space<vmem>>, vector<32x16xf32>
      tpu.vector_store %arg6[%c0_19, %c0_20], %33 {strides = array<i32>} : memref<32x16xf32, #tpu.memory_space<vmem>>, vector<32x16xf32>,
    } else {
    }
    %c0 = arith.constant 0 : index
    %c0_1 = arith.constant 0 : index
    %3 = vector.load %arg3[%c0, %c0_1] : memref<8x32xf32, #tpu.memory_space<vmem>>, vector<8x32xf32>
    %c0_2 = arith.constant 0 : index
    %c0_3 = arith.constant 0 : index
    %4 = vector.load %arg1[%c0_2, %c0_3] : memref<1x32xf32, #tpu.memory_space<vmem>>, vector<1x32xf32>
    %5 = vector.broadcast %4 : vector<1x32xf32> to vector<8x32xf32>
    %6 = arith.subf %3, %5 : vector<8x32xf32>
    %c0_4 = arith.constant 0 : index
    %c0_5 = arith.constant 0 : index
    %7 = vector.load %arg4[%c0_4, %c0_5] : memref<8x16xf32, #tpu.memory_space<vmem>>, vector<8x16xf32>
    %c0_6 = arith.constant 0 : index
    %c0_7 = arith.constant 0 : index
    %8 = vector.load %arg2[%c0_6, %c0_7] : memref<1x16xf32, #tpu.memory_space<vmem>>, vector<1x16xf32>
    %9 = vector.broadcast %8 : vector<1x16xf32> to vector<8x16xf32>
    %10 = arith.subf %7, %9 : vector<8x16xf32>
    %11 = arith.mulf %6, %6 : vector<8x32xf32>
    %cst = arith.constant dense<0.000000e+00> : vector<8xf32>
    %12 = vector.multi_reduction <add>, %11, %cst [1] : vector<8x32xf32> to vector<8xf32>
    %13 = vector.shape_cast %12 : vector<8xf32> to vector<8x1xf32>
    %14 = arith.mulf %10, %10 : vector<8x16xf32>
    %cst_8 = arith.constant dense<0.000000e+00> : vector<8xf32>
    %15 = vector.multi_reduction <add>, %14, %cst_8 [1] : vector<8x16xf32> to vector<8xf32>
    %16 = vector.shape_cast %15 : vector<8xf32> to vector<8x1xf32>
    %17 = math.rsqrt %13 : vector<8x1xf32>
    %cst_9 = arith.constant 9.99999995E+11 : f32
    %18 = vector.broadcast %cst_9 : f32 to vector<8x1xf32>
    %19 = arith.minimumf %17, %18 : vector<8x1xf32>
    %20 = math.rsqrt %16 : vector<8x1xf32>
    %cst_10 = arith.constant 9.99999995E+11 : f32
    %21 = vector.broadcast %cst_10 : f32 to vector<8x1xf32>
    %22 = arith.minimumf %20, %21 : vector<8x1xf32>
    %23 = arith.mulf %19, %22 : vector<8x1xf32>
    %24 = vector.broadcast %23 : vector<8x1xf32> to vector<8x16xf32>
    %25 = arith.mulf %10, %24 : vector<8x16xf32>
    %c0_11 = arith.constant 0 : index
    %c0_12 = arith.constant 0 : index
    %26 = vector.load %arg6[%c0_11, %c0_12] : memref<32x16xf32, #tpu.memory_space<vmem>>, vector<32x16xf32>
    %cst_13 = arith.constant dense<0.000000e+00> : vector<32x16xf32>
    %27 = tpu.matmul %6, %25, %cst_13 {dimension_numbers = #tpu.dot_dimension_numbers<[0], [0], [1], [1], [0, 1, 1, 1], [], []>} : vector<8x32xf32>, vector<8x16xf32>, vector<32x16xf32> -> vector<32x16xf32>
    %28 = arith.addf %26, %27 : vector<32x16xf32>
    %c0_14 = arith.constant 0 : index
    %c0_15 = arith.constant 0 : index
    %29 = vector.load %arg6[%c0_14, %c0_15] : memref<32x16xf32, #tpu.memory_space<vmem>>, vector<32x16xf32>
    tpu.vector_store %arg6[%c0_14, %c0_15], %28 {strides = array<i32>} : memref<32x16xf32, #tpu.memory_space<vmem>>, vector<32x16xf32>,
    %c0_i32_16 = arith.constant 0 : i32
    %30 = arith.cmpi eq, %arg0, %c0_i32_16 : i32
    %31 = arith.extui %30 : i1 to i32
    %c0_i32_17 = arith.constant 0 : i32
    %32 = arith.cmpi ne, %31, %c0_i32_17 : i32
    scf.if %32 {
      %c0_18 = arith.constant 0 : index
      %c0_19 = arith.constant 0 : index
      %33 = vector.load %arg6[%c0_18, %c0_19] : memref<32x16xf32, #tpu.memory_space<vmem>>, vector<32x16xf32>
      %34 = arith.mulf %33, %33 : vector<32x16xf32>
      %35 = vector.shape_cast %34 : vector<32x16xf32> to vector<1x32x16xf32>
      %cst_20 = arith.constant dense<0.000000e+00> : vector<1xf32>
      %36 = vector.multi_reduction <add>, %35, %cst_20 [1, 2] : vector<1x32x16xf32> to vector<1xf32>
      %37 = vector.shape_cast %36 : vector<1xf32> to vector<1x1x1xf32>
      %38 = vector.extract %37[0, 0, 0] : f32 from vector<1x1x1xf32>
      %cst_21 = arith.constant 5.120000e+02 : f32
      %39 = arith.divf %38, %cst_21 : f32
      %cst_22 = arith.constant 0.000000e+00 : f32
      %40 = arith.maximumf %39, %cst_22 : f32
      %c0_23 = arith.constant 0 : index
      %c0_24 = arith.constant 0 : index
      %41 = memref.load %arg5[%c0_23, %c0_24] : memref<1x1xf32, #tpu.memory_space<smem>>
      memref.store %40, %arg5[%c0_23, %c0_24] : memref<1x1xf32, #tpu.memory_space<smem>>
    } else {
    }
    return
  }
  func.func @transform_0(%arg0: i32) -> (i32, i32) {
    %c0_i32 = arith.constant 0 : i32
    %c0_i32_0 = arith.constant 0 : i32
    %c0_i32_1 = arith.constant 0 : i32
    return %c0_i32, %c0_i32_0 : i32, i32
  }
  func.func @transform_1(%arg0: i32) -> (i32, i32) {
    %c0_i32 = arith.constant 0 : i32
    %c0_i32_0 = arith.constant 0 : i32
    %c0_i32_1 = arith.constant 0 : i32
    return %c0_i32, %c0_i32_0 : i32, i32
  }
  func.func @transform_2(%arg0: i32) -> (i32, i32) {
    %c0_i32 = arith.constant 0 : i32
    %c0_i32_0 = arith.constant 0 : i32
    return %arg0, %c0_i32 : i32, i32
  }
  func.func @transform_3(%arg0: i32) -> (i32, i32) {
    %c0_i32 = arith.constant 0 : i32
    %c0_i32_0 = arith.constant 0 : i32
    return %arg0, %c0_i32 : i32, i32
  }
  func.func @transform_4(%arg0: i32) -> (i32, i32) {
    %c0_i32 = arith.constant 0 : i32
    %c0_i32_0 = arith.constant 0 : i32
    %c0_i32_1 = arith.constant 0 : i32
    return %c0_i32, %c0_i32_0 : i32, i32
  }
}

</mosaic_0001>

<bundles_post_ra>
// kernel: tpu_custom_call.1
= control target key start
LH: loop header
LB: loop body
LE: loop exit
PB: predicated region body
PF: predicated region fallthrough
CT: control target
= control target key end

     0   :  { %9 = vsyncpa [#allocation4], 0  ;;  %s456_s0 = inlined_call_operand.hbm [shape: f32[1,32], index: 0, kind: input, shape index: {}]   ;;  %s457_s1 = inlined_call_operand.vmem [shape: f32[1,16], index: 1, kind: input, shape index: {}]   ;;  %s458_s2 = inlined_call_operand.hbm [shape: f32[8,32], index: 2, kind: input, shape index: {}]   ;;  %s459_s3 = inlined_call_operand.vmem [shape: f32[8,16], index: 3, kind: input, shape index: {}]   ;;  %s460_s4 = inlined_call_operand.hbm [shape: f32[1,1], index: 4, kind: output, shape index: {}]  }
   0x1   :  { %10 = vsyncpa [#allocation7], 0 }
   0x2   :  { %11 = vsyncpa [#allocation5], 0  ;;  %s367_s15 = smov [#allocation3]   ;;  %s368_s17 = smov [#allocation6]  }
   0x3   :  { %s18_s16 = sshll.u32 %s367_s15, 4  ;;  %s30_s18 = sshll.u32 %s368_s17, 4  ;;  %s19_s16 = int_to_ptr.vmem [resolvable:$true] %s18_s16  ;;  %s31_s18 = int_to_ptr.vmem [resolvable:$true] %s30_s18 }
   0x4   :  { %s307_s21 = scalar_lea.hbm %s456_s0, 16 }
   0x5   :  { %p308_p0 = scmp.ne.s32.totalorder %s456_s0, %s307_s21  ;;  %p311_p1 = scmp.lt.u32.totalorder %s307_s21, %s456_s0 }
   0x7   :  { %p313_p2 = pnand %p311_p1, %p308_p0 }
   0x9   :  { %316 = shalt.err (!%p313_p2)
}
   0xa   :  { %s317_s26 = scalar_lea.vmem %s19_s16, 16  ;;  %s321_s27 = scalar_lea.vmem %s19_s16, 32 }
   0xb   :  { %p318_p3 = scmp.ne.s32.totalorder %s19_s16, %s317_s26  ;;  %p322_p4 = scmp.lt.s32.totalorder %s19_s16, %s19_s16 }
   0xc   :  { %p323_p5 = scmp.lt.s32.totalorder %s321_s27, %s317_s26 }
   0xe   :  { %p324_p6 = por %p323_p5, %p322_p4 }
  0x10   :  { %p325_p7 = pnand %p324_p6, %p318_p3 }
  0x12   :  { %328 = shalt.err (!%p325_p7)
}
  0x13   :  { %21 = dma.hbm_to_vmem [thread:$0]  %s456_s0, 16, %s19_s16, [#allocation4]  }
  0x14   :  { %s329_s6 = scalar_lea.hbm %s458_s2, 128 }
  0x15   :  { %p330_p8 = scmp.ne.s32.totalorder %s458_s2, %s329_s6  ;;  %p333_p9 = scmp.lt.u32.totalorder %s329_s6, %s458_s2 }
  0x17   :  { %p335_p10 = pnand %p333_p9, %p330_p8 }
  0x19   :  { %338 = shalt.err (!%p335_p10)
}
  0x1a   :  { %s339_s11 = scalar_lea.vmem %s31_s18, 128  ;;  %p344_p12 = scmp.lt.s32.totalorder %s31_s18, %s31_s18 }
  0x1b   :  { %p340_p11 = scmp.ne.s32.totalorder %s31_s18, %s339_s11  ;;  %p345_p13 = scmp.lt.s32.totalorder %s339_s11, %s339_s11 }
  0x1d   :  { %p346_p0 = por %p345_p13, %p344_p12 }
  0x1f   :  { %p347_p1 = pnand %p346_p0, %p340_p11 }
  0x21   :  { %350 = shalt.err (!%p347_p1)
}
  0x22   :  { %33 = dma.hbm_to_vmem [thread:$0]  %s458_s2, 128, %s31_s18, [#allocation7]  }
  0x23   :  { %361 = dma.done.wait [#allocation4], 16  }
  0x24   :  { %362 = vsyncadd [#allocation4], 4294967280 }
  0x25   :  { %363 = dma.done.wait [#allocation7], 128  }
  0x26   :  { %364 = vsyncadd [#allocation7], 4294967168  ;;  %v51_v0 = vld [vmem:[#allocation6] sm:$0xff]  ;;  %v275_v1 = vld [vmem:[#allocation3] ss:$0 sm:$0xff]  ;;  %vm70_vm0 = vcmask 261120  }
  0x27   :  { %v60_v2 = vld [vmem:[%s459_s3] sm:$0xff]  ;;  %v59_v3 = vsub.f32 %v51_v0, %v275_v1  ;;  %vm46_vm1 = vcmask 130048   ;;  %v369_v10 = vmov 0.0   ;;  %vm121_vm2 = vcmask 64512   ;;  %s370_s3 = smov 0.0   ;;  %s351_s20 = scalar_lea.hbm %s460_s4, 16 }
  0x28   :  { %v276_v4 = vld [vmem:[%s457_s1] ss:$0 sm:$0xff]  ;;  %48 = vst.msk [vmem:[#allocation2 + $0x8] sm:$0xff] %vm46_vm1, %v369_v10  ;;  %47 = vst.msk [vmem:[#allocation2] sm:$0xff] %vm46_vm1, %v369_v10  ;;  %p352_p2 = scmp.ne.s32.totalorder %s460_s4, %s351_s20  ;;  %p355_p3 = scmp.lt.u32.totalorder %s351_s20, %s460_s4 }
  0x29   :  { %v68_v5 = vsub.f32 %v60_v2, %v276_v4  ;;  %v69_v6 = vmul.f32 %v59_v3, %v59_v3  ;;  %89 = vxpose.xlu1.b32.start.end [1/1] (short) (narrow) %v59_v3, 32  ;;  %49 = vst.msk [vmem:[#allocation2 + $0x10] sm:$0xff] %vm46_vm1, %v369_v10  ;;  %50 = vst.msk [vmem:[#allocation2 + $0x18] sm:$0xff] %vm46_vm1, %v369_v10 }
  0x2a   :  { %p357_p4 = pnand %p355_p3, %p352_p2 }
  0x2b   :  { %v74_v7 = vmul.f32 %v68_v5, %v68_v5  ;;  %v71_v8 = vsel %vm70_vm0, %v69_v6, 0.0 }
  0x2c   :  { %72 = vadd.xlane.f32.xlu0 %v71_v8 }
  0x2d   :  { %v76_v9 = vsel %vm46_vm1, %v74_v7, 0.0 }
  0x2f   :  { %v86_v23 = vld [vmem:[#allocation2 + $0x8] sm:$0xff]  ;;  %v85_v25 = vld [vmem:[#allocation2] sm:$0xff] }
  0x30   :  { %77 = vadd.xlane.f32.xlu0 %v76_v9  ;;  %v88_v24 = vld [vmem:[#allocation2 + $0x18] sm:$0xff]  ;;  %v87_v26 = vld [vmem:[#allocation2 + $0x10] sm:$0xff] }
  0xa9   :  { %v105_v11 = vpop.trf.xlu1 }
  0xaa   :  { %288 = vmatprep.mubr.msk.f32.mxu0 %vm121_vm2, %v105_v11 }
  0xad   :  { %v106_v12 = vpop.trf.xlu1 }
  0xb1   :  { %v107_v13 = vpop.trf.xlu1 }
  0xb2   :  { %291 = vmatprep.mubr.msk.f32.mxu1 %vm121_vm2, %v107_v13 }
  0xb5   :  { %v108_v22 = vpop.trf.xlu1 }
  0xb9   :  { %v73_v14 = vpop.xlane.xlu0 %72 }
  0xba   :  { %303 = vrsqrt.f32 %v73_v14 }
  0xbd   :  { %v78_v15 = vpop.xlane.xlu0 %77 }
  0xbe   :  { %305 = vrsqrt.f32 %v78_v15 }
  0xc4   :  { %v304_v16 = vpop.eup %303 }
  0xc5   :  { %v80_v18 = vmin.f32 %v304_v16, 1e+12 }
  0xc8   :  { %v306_v17 = vpop.eup %305 }
  0xc9   :  { %v82_v19 = vmin.f32 %v306_v17, 1e+12 }
  0xcb   :  { %v83_v20 = vmul.f32 %v82_v19, %v80_v18 }
  0xcd   :  { %v84_v21 = vmul.f32 %v83_v20, %v68_v5 }
  0xcf   :  { %286 = vmatprep.subr.mxu0 %v84_v21  ;;  %294 = vmatprep.subr.mxu1 %v84_v21 }
  0xd0   :  { %287 = vmatpush3.msra.mxu0 %v84_v21  ;;  %295 = vmatpush3.msra.mxu1 %v84_v21 }
  0xd1   :  { %289 = vmatmul.mubr.msk.f32.vlgmr.msra.gmra.mrb[0].mxu0 %vm121_vm2, %v106_v12  ;;  %292 = vmatmul.mubr.msk.f32.vlgmr.msra.gmra.mrb[0].mxu1 %vm121_vm2, %v108_v22 }
 0x1a4   :  { %v290_v27 = vpop.f32.mrb[0].mxu0  ;;  %v293_v28 = vpop.f32.mrb[0].mxu1 }
 0x1a5   :  { %v220_v29 = vadd.f32 %v290_v27, %v86_v23  ;;  %v200_v30 = vpop.f32.mrb[1].mxu0  ;;  %v222_v31 = vadd.f32 %v293_v28, %v88_v24  ;;  %v210_v32 = vpop.f32.mrb[1].mxu1 }
 0x1a6   :  { %v219_v33 = vadd.f32 %v200_v30, %v85_v25  ;;  %v221_v34 = vadd.f32 %v210_v32, %v87_v26 }
 0x1a7   :  { %224 = vst.msk [vmem:[#allocation2 + $0x8] sm:$0xff] %vm46_vm1, %v220_v29  ;;  %226 = vst.msk [vmem:[#allocation2 + $0x18] sm:$0xff] %vm46_vm1, %v222_v31 }
 0x1a8   :  { %223 = vst.msk [vmem:[#allocation2] sm:$0xff] %vm46_vm1, %v219_v33  ;;  %225 = vst.msk [vmem:[#allocation2 + $0x10] sm:$0xff] %vm46_vm1, %v221_v34 }
 0x1ae   :  { %v231_v35 = vld [vmem:[#allocation2 + $0x8] sm:$0xff]  ;;  %v233_v38 = vld [vmem:[#allocation2 + $0x18] sm:$0xff] }
 0x1af   :  { %v230_v36 = vld [vmem:[#allocation2] sm:$0xff]  ;;  %v232_v37 = vld [vmem:[#allocation2 + $0x10] sm:$0xff]  ;;  %v235_v39 = vmul.f32 %v231_v35, %v231_v35  ;;  %v237_v43 = vmul.f32 %v233_v38, %v233_v38 }
 0x1b0   :  { %v234_v40 = vmul.f32 %v230_v36, %v230_v36  ;;  %v236_v41 = vmul.f32 %v232_v37, %v232_v37 }
 0x1b1   :  { %v239_v42 = vsel %vm46_vm1, %v235_v39, 0.0  ;;  %v243_v48 = vsel %vm46_vm1, %v237_v43, 0.0 }
 0x1b2   :  { %v238_v44 = vsel %vm46_vm1, %v234_v40, 0.0  ;;  %v241_v45 = vsel %vm46_vm1, %v236_v41, 0.0 }
 0x1b3   :  { %v240_v46 = vadd.f32 %v239_v42, %v238_v44 }
 0x1b5   :  { %v242_v47 = vadd.f32 %v241_v45, %v240_v46 }
 0x1b7   :  { %v244_v49 = vadd.f32 %v243_v48, %v242_v47 }
 0x1b9   :  { %245 = vadd.xlane.f32.xlu1 %v244_v49 }
 0x246   :  { %v246_v50 = vpop.xlane.xlu1 %245 }
 0x247   :  { %v247_v51 = vrot.slane %v246_v50, 4 }
 0x249   :  { %v248_v52 = vadd.f32 %v247_v51, %v246_v50 }
 0x24b   :  { %v249_v53 = vrot.slane %v248_v52, 2 }
 0x24d   :  { %v250_v54 = vadd.f32 %v249_v53, %v248_v52 }
 0x24f   :  { %v251_v55 = vrot.slane %v250_v54, 1 }
 0x251   :  { %v252_v56 = vadd.f32 %v251_v55, %v250_v54 }
 0x253   :  { %296 = vpush %v252_v56 }
 0x284   :  { %s297_s1 = spop %296 }
 0x285   :  { %s256_s2 = smul.f32 0.001953125, %s297_s1 }
 0x287   :  { %s257_s17 = smax.f32 %s370_s3, %s256_s2 }
 0x288   :  { %259 = sst [smem:[#allocation8]] %s257_s17 }
 0x289   :  { %360 = shalt.err (!%p357_p4)
}
 0x28a   :  { %s371_s25 = smov [#allocation8]  }
 0x28b   :  { %267 = dma.smem_to_hbm %s371_s25, 16, %s460_s4, [#allocation5]  }
 0x28c   :  { %365 = dma.done.wait [#allocation5], 16  }
 0x28d   :  { %366 = vsyncadd [#allocation5], 4294967280 }
 0x28e   :  { %271 = sfence }
 0x28f   :  { %272 = vsyncpa [#allocation4], 1 }
 0x290   :  { %273 = vsyncpa [#allocation7], 1 }
 0x291   :  { %274 = vsyncpa [#allocation5], 1 }

</bundles_post_ra>
